<compile_context>
chip_gen: v5e
topology: v5e:2x2
jax: 0.10.0
libtpu: 0.0.40
codegen_flags: <defaults>
</compile_context>

<pallas_src>
import math

import jax
import jax.numpy as jnp
from jax import lax
from jax.experimental import pallas as pl
from jax.experimental.pallas import tpu as pltpu


def ncf_kernel(u_ref, it_ref,                 # (bm, U), (bm, I) streamed batch tiles
               w1_ref, b1_ref,                # dense1: (U, k) bf16, (1, k) f32
               w2_ref, b2_ref,                # dense2: (I, k) bf16, (1, k) f32
               wf1u_ref, wf1i_ref, bf1_ref,   # fc1 split: (k, k), (k, k) bf16, (1, k) f32
               wf2_ref, bf2_ref,              # fc2: (k, k2) bf16, (1, k2) f32
               wf3_ref, bf3_ref,              # fc3: (1, k2) bf16 row + scalar bias (SMEM)
               out_ref):                      # (1, bm) f32 lane-dense output slab
    f32 = jnp.float32
    cd = w1_ref.dtype                         # compute dtype (bf16)

    # Cast the streamed inputs in-kernel (keeps HBM traffic at the source dtype).
    u = u_ref[...].astype(cd)
    it = it_ref[...].astype(cd)

    # dense1 / dense2 + relu (two real dots; no zero-padded block-diagonal weight).
    hu = jnp.maximum(
        jnp.dot(u, w1_ref[...], preferred_element_type=f32) + b1_ref[...], 0.0)
    hi = jnp.maximum(
        jnp.dot(it, w2_ref[...], preferred_element_type=f32) + b2_ref[...], 0.0)

    # fc1 + relu, without the concat:
    #   concat(hu, hi) @ Wf1^T == hu @ Wf1^T[:k] + hi @ Wf1^T[k:]
    x = (jnp.dot(hu.astype(cd), wf1u_ref[...], preferred_element_type=f32)
         + jnp.dot(hi.astype(cd), wf1i_ref[...], preferred_element_type=f32)
         + bf1_ref[...])
    x = jnp.maximum(x, 0.0)

    # fc2 + relu
    x = jnp.dot(x.astype(cd), wf2_ref[...],
                preferred_element_type=f32) + bf2_ref[...]
    x = jnp.maximum(x, 0.0)

    # fc3 as (1, k2) @ (bm, k2)^T -> (1, bm): lane-dense result, no masked stores.
    logits = lax.dot_general(wf3_ref[...], x.astype(wf3_ref.dtype),
                             (((1,), (1,)), ((), ())),
                             preferred_element_type=f32)
    out_ref[...] = jax.nn.sigmoid(logits + bf3_ref[0, 0])


def init_linear(key, in_f, out_f):
    # Mimic torch.nn.Linear default init: U(-1/sqrt(in_f), 1/sqrt(in_f))
    kw, kb = jax.random.split(key)
    bound = 1.0 / math.sqrt(in_f)
    w = jax.random.uniform(kw, (out_f, in_f), jnp.float32, -bound, bound)
    b = jax.random.uniform(kb, (out_f,), jnp.float32, -bound, bound)
    return w, b


def make_params(users_dim, items_dim, k, key):
    k2 = k // 2
    keys = jax.random.split(key, 5)
    w1, b1 = init_linear(keys[0], users_dim, k)       # dense1
    w2, b2 = init_linear(keys[1], items_dim, k)       # dense2
    wf1, bf1 = init_linear(keys[2], 2 * k, k)         # fc1
    wf2, bf2 = init_linear(keys[3], k, k2)            # fc2
    wf3, bf3 = init_linear(keys[4], k2, 1)            # fc3
    return dict(w1=w1, b1=b1, w2=w2, b2=b2,
                wf1=wf1, bf1=bf1, wf2=wf2, bf2=bf2, wf3=wf3, bf3=bf3)


def ncf_forward(users, items, params, k, *, bm=4096, compute_dtype=jnp.bfloat16):
    B, U = users.shape
    _, I = items.shape
    k2 = k // 2

    # Batch tile: multiple of 128 (lane-aligned (1, bm) output, sublane-aligned
    # inputs), 128..8192, no bigger than the lane-rounded batch.
    bm = max(128, min(bm, 8192))
    bm = (bm // 128) * 128
    bm = min(bm, pl.cdiv(B, 128) * 128)
    # Prefer >=2 grid steps when the batch allows it: the "parallel" axis can
    # then shard tiles across v7x's two TensorCores (no-op on v5e/v6e).
    while bm > 128 and pl.cdiv(B, bm) < 2:
        bm = max(128, ((bm // 2) // 128) * 128)
    n_tiles = pl.cdiv(B, bm)

    # VMEM-resident weights in compute dtype (bf16); biases stay f32 and are
    # added to the f32 accumulators (v5e VPU has no bf16).
    w1 = params["w1"].T.astype(compute_dtype)          # (U, k)
    w2 = params["w2"].T.astype(compute_dtype)          # (I, k)
    wf1_t = params["wf1"].T                             # (2k, k)
    wf1u = wf1_t[:k].astype(compute_dtype)              # (k, k)  applies to hu
    wf1i = wf1_t[k:].astype(compute_dtype)              # (k, k)  applies to hi
    wf2 = params["wf2"].T.astype(compute_dtype)         # (k, k2)
    wf3 = params["wf3"].astype(compute_dtype)           # (1, k2) torch layout, used as row

    b1 = params["b1"].reshape(1, k)
    b2 = params["b2"].reshape(1, k)
    bf1 = params["bf1"].reshape(1, k)
    bf2 = params["bf2"].reshape(1, k2)
    bf3 = params["bf3"].reshape(1, 1)                    # scalar -> SMEM

    def resident(shape):
        return pl.BlockSpec(shape, lambda i: (0, 0))

    in_el = users.dtype.itemsize
    w_el = jnp.dtype(compute_dtype).itemsize
    w_bytes = (w1.size + w2.size + wf1u.size + wf1i.size + wf2.size + wf3.size) * w_el
    b_bytes = (b1.size + b2.size + bf1.size + bf2.size + bf3.size) * 4
    cost = pl.CostEstimate(
        flops=2 * B * (U * k + I * k + 2 * k * k + k * k2 + k2),
        transcendentals=B,
        bytes_accessed=B * (U + I) * in_el + B * 4 + w_bytes + b_bytes,
    )

    out = pl.pallas_call(
        ncf_kernel,
        out_shape=jax.ShapeDtypeStruct((1, B), jnp.float32),
        grid=(n_tiles,),
        in_specs=[
            pl.BlockSpec((bm, U), lambda i: (i, 0)),        # streamed users tile
            pl.BlockSpec((bm, I), lambda i: (i, 0)),        # streamed items tile
            resident((U, k)),                               # dense1 W
            resident((1, k)),                               # dense1 b
            resident((I, k)),                               # dense2 W
            resident((1, k)),                               # dense2 b
            resident((k, k)),                               # fc1 W (user half)
            resident((k, k)),                               # fc1 W (item half)
            resident((1, k)),                               # fc1 b
            resident((k, k2)),                              # fc2 W
            resident((1, k2)),                              # fc2 b
            resident((1, k2)),                              # fc3 W row
            pl.BlockSpec(memory_space=pltpu.MemorySpace.SMEM),  # fc3 scalar bias
        ],
        out_specs=pl.BlockSpec((1, bm), lambda i: (0, i)),  # lane-dense output slab
        compiler_params=pltpu.CompilerParams(
            dimension_semantics=("parallel",),   # shards tiles across v7x's 2 TCs
            vmem_limit_bytes=32 * 1024 * 1024,   # safe on every generation
        ),
        cost_estimate=cost,
    )(users, items, w1, b1, w2, b2, wf1u, wf1i, bf1, wf2, bf2, wf3, bf3)

    return out[0].reshape(B, 1)


def ncf_reference(users, items, params, compute_dtype=jnp.bfloat16):
    # Mirrors the kernel numerics: bf16 matmul operands, f32 accumulation,
    # f32 bias / relu / sigmoid.  (A pure-f32 torch forward differs slightly.)
    def lin(x, w, b):
        return jnp.dot(x.astype(compute_dtype), w.astype(compute_dtype).T,
                       preferred_element_type=jnp.float32) + b
    hu = jax.nn.relu(lin(users, params["w1"], params["b1"]))
    hi = jax.nn.relu(lin(items, params["w2"], params["b2"]))
    x = jnp.concatenate([hu, hi], axis=1)
    x = jax.nn.relu(lin(x, params["wf1"], params["bf1"]))
    x = jax.nn.relu(lin(x, params["wf2"], params["bf2"]))
    return jax.nn.sigmoid(lin(x, params["wf3"], params["bf3"]))


if __name__ == "__main__":
    # B deliberately NOT a multiple of bm: exercises the ragged final tile
    # (no wrapper-side pad; garbage rows are confined and discarded).
    B, USERS, ITEMS, K = 500, 32, 32, 32

    key = jax.random.PRNGKey(0)
    k_u, k_i, k_p = jax.random.split(key, 3)
    users = jax.random.normal(k_u, (B, USERS), jnp.float32)
    items = jax.random.normal(k_i, (B, ITEMS), jnp.float32)
    params = make_params(USERS, ITEMS, K, k_p)

    out = ncf_forward(users, items, params, K, bm=128)   # 4-step grid at this size
    out = jax.block_until_ready(out)

    ref = ncf_reference(users, items, params)
    assert out.shape == (B, 1)
    err = float(jnp.max(jnp.abs(out - ref)))
    assert jnp.allclose(out, ref, atol=2e-3, rtol=2e-3), err

    print("KERNEL_OK")
</pallas_src>

<mosaic_0001>
module attributes {stable_mosaic.version = 11 : i64} {
  func.func @ncf_kernel(%arg0: i32, %arg1: memref<128x32xf32, #tpu.memory_space<vmem>>, %arg2: memref<128x32xf32, #tpu.memory_space<vmem>>, %arg3: memref<32x32xbf16, #tpu.memory_space<vmem>>, %arg4: memref<1x32xf32, #tpu.memory_space<vmem>>, %arg5: memref<32x32xbf16, #tpu.memory_space<vmem>>, %arg6: memref<1x32xf32, #tpu.memory_space<vmem>>, %arg7: memref<32x32xbf16, #tpu.memory_space<vmem>>, %arg8: memref<32x32xbf16, #tpu.memory_space<vmem>>, %arg9: memref<1x32xf32, #tpu.memory_space<vmem>>, %arg10: memref<32x16xbf16, #tpu.memory_space<vmem>>, %arg11: memref<1x16xf32, #tpu.memory_space<vmem>>, %arg12: memref<1x16xbf16, #tpu.memory_space<vmem>>, %arg13: memref<1x1xf32, #tpu.memory_space<smem>>, %arg14: memref<1x128xf32, #tpu.memory_space<vmem>>) attributes {dimension_semantics = [#tpu.dimension_semantics<parallel>], iteration_bounds = array<i64: 4>, scalar_prefetch = 0 : i64, scratch_operands = 0 : i64, tpu.core_type = #tpu.core_type<tc>, window_params = [{transform_indices = @transform_0, window_bounds = array<i64: 128, 32>}, {transform_indices = @transform_1, window_bounds = array<i64: 128, 32>}, {pipeline_mode = #tpu.pipeline_mode<synchronous>, transform_indices = @transform_2, window_bounds = array<i64: 32, 32>}, {pipeline_mode = #tpu.pipeline_mode<synchronous>, transform_indices = @transform_3, window_bounds = array<i64: 1, 32>}, {pipeline_mode = #tpu.pipeline_mode<synchronous>, transform_indices = @transform_4, window_bounds = array<i64: 32, 32>}, {pipeline_mode = #tpu.pipeline_mode<synchronous>, transform_indices = @transform_5, window_bounds = array<i64: 1, 32>}, {pipeline_mode = #tpu.pipeline_mode<synchronous>, transform_indices = @transform_6, window_bounds = array<i64: 32, 32>}, {pipeline_mode = #tpu.pipeline_mode<synchronous>, transform_indices = @transform_7, window_bounds = array<i64: 32, 32>}, {pipeline_mode = #tpu.pipeline_mode<synchronous>, transform_indices = @transform_8, window_bounds = array<i64: 1, 32>}, {pipeline_mode = #tpu.pipeline_mode<synchronous>, transform_indices = @transform_9, window_bounds = array<i64: 32, 16>}, {pipeline_mode = #tpu.pipeline_mode<synchronous>, transform_indices = @transform_10, window_bounds = array<i64: 1, 16>}, {pipeline_mode = #tpu.pipeline_mode<synchronous>, transform_indices = @transform_11, window_bounds = array<i64: 1, 16>}, {transform_indices = @transform_12, window_bounds = array<i64: 1, 1>}, {transform_indices = @transform_13, window_bounds = array<i64: 1, 128>}]} {
    %c0 = arith.constant 0 : index
    %c0_0 = arith.constant 0 : index
    %0 = vector.load %arg1[%c0, %c0_0] : memref<128x32xf32, #tpu.memory_space<vmem>>, vector<128x32xf32>
    %1 = arith.truncf %0 : vector<128x32xf32> to vector<128x32xbf16>
    %c0_1 = arith.constant 0 : index
    %c0_2 = arith.constant 0 : index
    %2 = vector.load %arg2[%c0_1, %c0_2] : memref<128x32xf32, #tpu.memory_space<vmem>>, vector<128x32xf32>
    %3 = arith.truncf %2 : vector<128x32xf32> to vector<128x32xbf16>
    %c0_3 = arith.constant 0 : index
    %c0_4 = arith.constant 0 : index
    %4 = vector.load %arg3[%c0_3, %c0_4] : memref<32x32xbf16, #tpu.memory_space<vmem>>, vector<32x32xbf16>
    %cst = arith.constant dense<0.000000e+00> : vector<128x32xf32>
    %5 = tpu.matmul %1, %4, %cst {dimension_numbers = #tpu.dot_dimension_numbers<[1], [0], [0], [1], [0, 0, 1, 1], [], []>} : vector<128x32xbf16>, vector<32x32xbf16>, vector<128x32xf32> -> vector<128x32xf32>
    %c0_5 = arith.constant 0 : index
    %c0_6 = arith.constant 0 : index
    %6 = vector.load %arg4[%c0_5, %c0_6] : memref<1x32xf32, #tpu.memory_space<vmem>>, vector<1x32xf32>
    %7 = vector.broadcast %6 : vector<1x32xf32> to vector<128x32xf32>
    %8 = arith.addf %5, %7 : vector<128x32xf32>
    %cst_7 = arith.constant 0.000000e+00 : f32
    %9 = vector.broadcast %cst_7 : f32 to vector<128x32xf32>
    %10 = arith.maximumf %8, %9 : vector<128x32xf32>
    %c0_8 = arith.constant 0 : index
    %c0_9 = arith.constant 0 : index
    %11 = vector.load %arg5[%c0_8, %c0_9] : memref<32x32xbf16, #tpu.memory_space<vmem>>, vector<32x32xbf16>
    %cst_10 = arith.constant dense<0.000000e+00> : vector<128x32xf32>
    %12 = tpu.matmul %3, %11, %cst_10 {dimension_numbers = #tpu.dot_dimension_numbers<[1], [0], [0], [1], [0, 0, 1, 1], [], []>} : vector<128x32xbf16>, vector<32x32xbf16>, vector<128x32xf32> -> vector<128x32xf32>
    %c0_11 = arith.constant 0 : index
    %c0_12 = arith.constant 0 : index
    %13 = vector.load %arg6[%c0_11, %c0_12] : memref<1x32xf32, #tpu.memory_space<vmem>>, vector<1x32xf32>
    %14 = vector.broadcast %13 : vector<1x32xf32> to vector<128x32xf32>
    %15 = arith.addf %12, %14 : vector<128x32xf32>
    %cst_13 = arith.constant 0.000000e+00 : f32
    %16 = vector.broadcast %cst_13 : f32 to vector<128x32xf32>
    %17 = arith.maximumf %15, %16 : vector<128x32xf32>
    %18 = arith.truncf %10 : vector<128x32xf32> to vector<128x32xbf16>
    %c0_14 = arith.constant 0 : index
    %c0_15 = arith.constant 0 : index
    %19 = vector.load %arg7[%c0_14, %c0_15] : memref<32x32xbf16, #tpu.memory_space<vmem>>, vector<32x32xbf16>
    %cst_16 = arith.constant dense<0.000000e+00> : vector<128x32xf32>
    %20 = tpu.matmul %18, %19, %cst_16 {dimension_numbers = #tpu.dot_dimension_numbers<[1], [0], [0], [1], [0, 0, 1, 1], [], []>} : vector<128x32xbf16>, vector<32x32xbf16>, vector<128x32xf32> -> vector<128x32xf32>
    %21 = arith.truncf %17 : vector<128x32xf32> to vector<128x32xbf16>
    %c0_17 = arith.constant 0 : index
    %c0_18 = arith.constant 0 : index
    %22 = vector.load %arg8[%c0_17, %c0_18] : memref<32x32xbf16, #tpu.memory_space<vmem>>, vector<32x32xbf16>
    %cst_19 = arith.constant dense<0.000000e+00> : vector<128x32xf32>
    %23 = tpu.matmul %21, %22, %cst_19 {dimension_numbers = #tpu.dot_dimension_numbers<[1], [0], [0], [1], [0, 0, 1, 1], [], []>} : vector<128x32xbf16>, vector<32x32xbf16>, vector<128x32xf32> -> vector<128x32xf32>
    %24 = arith.addf %20, %23 : vector<128x32xf32>
    %c0_20 = arith.constant 0 : index
    %c0_21 = arith.constant 0 : index
    %25 = vector.load %arg9[%c0_20, %c0_21] : memref<1x32xf32, #tpu.memory_space<vmem>>, vector<1x32xf32>
    %26 = vector.broadcast %25 : vector<1x32xf32> to vector<128x32xf32>
    %27 = arith.addf %24, %26 : vector<128x32xf32>
    %cst_22 = arith.constant 0.000000e+00 : f32
    %28 = vector.broadcast %cst_22 : f32 to vector<128x32xf32>
    %29 = arith.maximumf %27, %28 : vector<128x32xf32>
    %30 = arith.truncf %29 : vector<128x32xf32> to vector<128x32xbf16>
    %c0_23 = arith.constant 0 : index
    %c0_24 = arith.constant 0 : index
    %31 = vector.load %arg10[%c0_23, %c0_24] : memref<32x16xbf16, #tpu.memory_space<vmem>>, vector<32x16xbf16>
    %cst_25 = arith.constant dense<0.000000e+00> : vector<128x16xf32>
    %32 = tpu.matmul %30, %31, %cst_25 {dimension_numbers = #tpu.dot_dimension_numbers<[1], [0], [0], [1], [0, 0, 1, 1], [], []>} : vector<128x32xbf16>, vector<32x16xbf16>, vector<128x16xf32> -> vector<128x16xf32>
    %c0_26 = arith.constant 0 : index
    %c0_27 = arith.constant 0 : index
    %33 = vector.load %arg11[%c0_26, %c0_27] : memref<1x16xf32, #tpu.memory_space<vmem>>, vector<1x16xf32>
    %34 = vector.broadcast %33 : vector<1x16xf32> to vector<128x16xf32>
    %35 = arith.addf %32, %34 : vector<128x16xf32>
    %cst_28 = arith.constant 0.000000e+00 : f32
    %36 = vector.broadcast %cst_28 : f32 to vector<128x16xf32>
    %37 = arith.maximumf %35, %36 : vector<128x16xf32>
    %c0_29 = arith.constant 0 : index
    %c0_30 = arith.constant 0 : index
    %38 = vector.load %arg12[%c0_29, %c0_30] : memref<1x16xbf16, #tpu.memory_space<vmem>>, vector<1x16xbf16>
    %39 = arith.truncf %37 : vector<128x16xf32> to vector<128x16xbf16>
    %cst_31 = arith.constant dense<0.000000e+00> : vector<1x128xf32>
    %40 = tpu.matmul %38, %39, %cst_31 {dimension_numbers = #tpu.dot_dimension_numbers<[1], [1], [0], [0], [0, 0, 1, 0], [], []>} : vector<1x16xbf16>, vector<128x16xbf16>, vector<1x128xf32> -> vector<1x128xf32>
    %c0_32 = arith.constant 0 : index
    %c0_33 = arith.constant 0 : index
    %41 = memref.load %arg13[%c0_32, %c0_33] : memref<1x1xf32, #tpu.memory_space<smem>>
    %42 = vector.broadcast %41 : f32 to vector<1x128xf32>
    %43 = arith.addf %40, %42 : vector<1x128xf32>
    %44 = arith.negf %43 : vector<1x128xf32>
    %45 = math.exp %44 : vector<1x128xf32>
    %cst_34 = arith.constant 1.000000e+00 : f32
    %46 = vector.broadcast %cst_34 : f32 to vector<1x128xf32>
    %47 = arith.addf %46, %45 : vector<1x128xf32>
    %48 = arith.divf %46, %47 : vector<1x128xf32>
    %c0_35 = arith.constant 0 : index
    %c0_36 = arith.constant 0 : index
    %49 = vector.load %arg14[%c0_35, %c0_36] : memref<1x128xf32, #tpu.memory_space<vmem>>, vector<1x128xf32>
    tpu.vector_store %arg14[%c0_35, %c0_36], %48 {strides = array<i32>} : memref<1x128xf32, #tpu.memory_space<vmem>>, vector<1x128xf32>,
    return
  }
  func.func @transform_0(%arg0: i32) -> (i32, i32) {
    %c0_i32 = arith.constant 0 : i32
    %c0_i32_0 = arith.constant 0 : i32
    return %arg0, %c0_i32 : i32, i32
  }
  func.func @transform_1(%arg0: i32) -> (i32, i32) {
    %c0_i32 = arith.constant 0 : i32
    %c0_i32_0 = arith.constant 0 : i32
    return %arg0, %c0_i32 : i32, i32
  }
  func.func @transform_2(%arg0: i32) -> (i32, i32) {
    %c0_i32 = arith.constant 0 : i32
    %c0_i32_0 = arith.constant 0 : i32
    %c0_i32_1 = arith.constant 0 : i32
    return %c0_i32, %c0_i32_0 : i32, i32
  }
  func.func @transform_3(%arg0: i32) -> (i32, i32) {
    %c0_i32 = arith.constant 0 : i32
    %c0_i32_0 = arith.constant 0 : i32
    %c0_i32_1 = arith.constant 0 : i32
    return %c0_i32, %c0_i32_0 : i32, i32
  }
  func.func @transform_4(%arg0: i32) -> (i32, i32) {
    %c0_i32 = arith.constant 0 : i32
    %c0_i32_0 = arith.constant 0 : i32
    %c0_i32_1 = arith.constant 0 : i32
    return %c0_i32, %c0_i32_0 : i32, i32
  }
  func.func @transform_5(%arg0: i32) -> (i32, i32) {
    %c0_i32 = arith.constant 0 : i32
    %c0_i32_0 = arith.constant 0 : i32
    %c0_i32_1 = arith.constant 0 : i32
    return %c0_i32, %c0_i32_0 : i32, i32
  }
  func.func @transform_6(%arg0: i32) -> (i32, i32) {
    %c0_i32 = arith.constant 0 : i32
    %c0_i32_0 = arith.constant 0 : i32
    %c0_i32_1 = arith.constant 0 : i32
    return %c0_i32, %c0_i32_0 : i32, i32
  }
  func.func @transform_7(%arg0: i32) -> (i32, i32) {
    %c0_i32 = arith.constant 0 : i32
    %c0_i32_0 = arith.constant 0 : i32
    %c0_i32_1 = arith.constant 0 : i32
    return %c0_i32, %c0_i32_0 : i32, i32
  }
  func.func @transform_8(%arg0: i32) -> (i32, i32) {
    %c0_i32 = arith.constant 0 : i32
    %c0_i32_0 = arith.constant 0 : i32
    %c0_i32_1 = arith.constant 0 : i32
    return %c0_i32, %c0_i32_0 : i32, i32
  }
  func.func @transform_9(%arg0: i32) -> (i32, i32) {
    %c0_i32 = arith.constant 0 : i32
    %c0_i32_0 = arith.constant 0 : i32
    %c0_i32_1 = arith.constant 0 : i32
    return %c0_i32, %c0_i32_0 : i32, i32
  }
  func.func @transform_10(%arg0: i32) -> (i32, i32) {
    %c0_i32 = arith.constant 0 : i32
    %c0_i32_0 = arith.constant 0 : i32
    %c0_i32_1 = arith.constant 0 : i32
    return %c0_i32, %c0_i32_0 : i32, i32
  }
  func.func @transform_11(%arg0: i32) -> (i32, i32) {
    %c0_i32 = arith.constant 0 : i32
    %c0_i32_0 = arith.constant 0 : i32
    %c0_i32_1 = arith.constant 0 : i32
    return %c0_i32, %c0_i32_0 : i32, i32
  }
  func.func @transform_12(%arg0: i32) -> (i32, i32) {
    %c0_i32 = arith.constant 0 : i32
    %c0_i32_0 = arith.constant 0 : i32
    %c0_i32_1 = arith.constant 0 : i32
    return %c0_i32, %c0_i32_0 : i32, i32
  }
  func.func @transform_13(%arg0: i32) -> (i32, i32) {
    %c0_i32 = arith.constant 0 : i32
    %c0_i32_0 = arith.constant 0 : i32
    return %c0_i32, %arg0 : i32, i32
  }
}

</mosaic_0001>

<bundles_post_ra>
// kernel: tpu_custom_call.1
= control target key start
LH: loop header
LB: loop body
LE: loop exit
PB: predicated region body
PF: predicated region fallthrough
CT: control target
= control target key end

     0   :  { %s1834_s0 = inlined_call_operand.vmem [shape: f32[500,32], index: 0, kind: input, shape index: {}]   ;;  %s1835_s1 = inlined_call_operand.vmem [shape: f32[500,32], index: 1, kind: input, shape index: {}]   ;;  %s1836_s2 = inlined_call_operand.vmem [shape: bf16[32,32], index: 2, kind: input, shape index: {}]   ;;  %s1837_s3 = inlined_call_operand.vmem [shape: f32[1,32], index: 3, kind: input, shape index: {}]   ;;  %s1838_s4 = inlined_call_operand.vmem [shape: bf16[32,32], index: 4, kind: input, shape index: {}]   ;;  %s1839_s5 = inlined_call_operand.vmem [shape: f32[1,32], index: 5, kind: input, shape index: {}]   ;;  %s1840_s6 = inlined_call_operand.vmem [shape: bf16[32,32], index: 6, kind: input, shape index: {}]   ;;  %s1841_s7 = inlined_call_operand.vmem [shape: bf16[32,32], index: 7, kind: input, shape index: {}]   ;;  %s1842_s8 = inlined_call_operand.vmem [shape: f32[1,32], index: 8, kind: input, shape index: {}]   ;;  %s1843_s9 = inlined_call_operand.vmem [shape: bf16[32,16], index: 9, kind: input, shape index: {}]   ;;  %s1844_s10 = inlined_call_operand.vmem [shape: f32[1,16], index: 10, kind: input, shape index: {}]   ;;  %s1845_s11 = inlined_call_operand.vmem [shape: bf16[1,16], index: 11, kind: input, shape index: {}]   ;;  %s1846_s12 = inlined_call_operand.<no memory space> [shape: f32[1,1], index: 12, kind: input, shape index: {}]   ;;  %s1847_s13 = inlined_call_operand.hbm [shape: f32[1,500], index: 13, kind: output, shape index: {}]  }
   0x1   :  { %1848 = sst [smem:[#allocation6_spill]] %s1834_s0 }
   0x2   :  { %1849 = sst [smem:[#allocation7_spill]] %s1835_s1 }
   0x3   :  { %18 = sst [smem:[#allocation2]] %s1846_s12 }
   0x4   :  { %19 = vsyncpa [#allocation4], 0 }
   0x5   :  { %21 = vsyncpa [#allocation4 + $0x1], 0  ;;  %s1560_s27 = smov 0   ;;  %s1562_s28 = smov 0  }
   0x6   :  { %s1564_s29 = smov 0   ;;  %s1566_s30 = smov 0  }
   0x7 LB: > { %s1581_s12 = sadd.s32 4294967295, %s1485_s30   ;;  %s1270_s14 = sadd.s32 4294967294, %s1485_s30   ;;  %s1485_s30 = sphi %s1566_s30, %s1857_s30   ;;  %s1481_s29 = sphi %s1564_s29, %s1856_s29   ;;  %s1477_s28 = sphi %s1562_s28, %s1855_s28   ;;  %s1473_s27 = sphi %s1560_s27, %s1854_s27  }
   0x8   : > { %s1585_s15 = sadd.s32 1, %s1485_s30   ;;  %s317_s16 = sadd.s32 1, %s1481_s29 }
   0x9   : > { %s314_s17 = ssub.s32 %s1485_s30, %s1585_s15  ;;  %p327_p0 = scmp.ne.s32.totalorder %s1481_s29, %s1477_s28 }
   0xa   : > { %p315_p1 = scmp.eq.s32.totalorder %s314_s17, 0  ;;  %p328_p2 = scmp.eq.s32.totalorder %s1581_s12, 3 }
   0xb   : > { %p333_p3 = scmp.ne.s32.totalorder %s1477_s28, %s1473_s27  ;;  %p334_p4 = scmp.eq.s32.totalorder %s1270_s14, 3 }
   0xc   : > { %s1596_s18 = scalar_select %p315_p1, %s1481_s29, %s317_s16  }
   0xd   : > { %p1598_p5 = por %p328_p2, %p327_p0  ;;  %p1602_p6 = por %p334_p4, %p333_p3 }
   0xe   : > { %p1273_p7 = scmp.ge.s32.totalorder %s1485_s30, 1  ;;  %p419_p8 = scmp.lt.s32.totalorder %s1485_s30, 5 }
  0x10   : > { %p420_p9 = pnand %p1273_p7, %p419_p8 }
  0x11   : > { %s1274_s25 = sshll.u32 (!%p420_p9), %s1581_s12, 4  ;;  %s1852_s0 = sld [smem:[#allocation6_spill]] (!%p420_p9) }
  0x12   : > { %423 = sbr.rel (%p420_p9) target bundleno = 795 (0x31b), region = 72  ;;  %p480_p10 = scmp.lt.s32.totalorder (!%p420_p9), %s1274_s25, 62 }
  0x13   : > { %s1853_s1 = sld [smem:[#allocation7_spill]] (!%p420_p9) }
  0x14   : > { %s1127_s23 = sld [smem:[#allocation2]] (!%p420_p9) }
  0x17   : > { %v1363_v0 = vld [vmem:[%s1836_s2 + $0x8] sm:$0xff]  ;;  %v1362_v2 = vld [vmem:[%s1836_s2] sm:$0xff]  ;;  %s1859_s25 = smov (!%p480_p10, %s1274_s25), 62  ;;  %vm572_vm0 = vcmask 261120   ;;  %vm1129_vm1 = vcmask 130048  }
  0x18   : > { %v1365_v1 = vld [vmem:[%s1838_s4 + $0x8] sm:$0xff]  ;;  %603 = vmatpush.bf16.msra.mxu0 %v1363_v0  ;;  %v1364_v3 = vld [vmem:[%s1838_s4] sm:$0xff]  ;;  %1372 = vmatpush.bf16.msra.mxu2 %v1363_v0  ;;  %s1275_s21 = sshll.u32 %s1859_s25, 3  ;;  %s1199_s25 = scalar_lea.hbm %s1847_s13, %s1581_s12 }
  0x19   : > { %712 = vmatpush.bf16.msra.mxu1 %v1365_v1  ;;  %1373 = vmatpush.bf16.msra.mxu3 %v1363_v0  ;;  %s1624_s24 = scalar_lea.vmem %s1852_s0, %s1275_s21  ;;  %s1629_s16 = scalar_lea.vmem %s1853_s1, %s1275_s21  ;;  %v1369_v49 = vld [vmem:[%s1841_s7 + $0x8] sm:$0xff]  ;;  %v1368_v51 = vld [vmem:[%s1841_s7] sm:$0xff] }
  0x1a   : > { %v504_v4 = vld [vmem:[%s1624_s24] sm:$0xff]  ;;  %v505_v5 = vld [vmem:[%s1624_s24 + $0x8] sm:$0xff]  ;;  %v510_v10 = vld [vmem:[%s1624_s24 + $0x30] sm:$0xff]  ;;  %s1203_s22 = sshll.u32 %s1199_s25, 4  ;;  %s1443_s25 = scalar_lea.hbm %s1847_s13, 4  ;;  %s1204_s22 = int_to_ptr.hbm [resolvable:$true] %s1203_s22 }
  0x1b   : > { %v528_v6 = vld [vmem:[%s1629_s16] sm:$0xff]  ;;  %v520_v7 = vpack.c.bf16 %v505_v5, %v504_v4  ;;  %v529_v8 = vld [vmem:[%s1629_s16 + $0x8] sm:$0xff]  ;;  %v511_v11 = vld [vmem:[%s1624_s24 + $0x38] sm:$0xff]  ;;  %s1437_s12 = sshra.s32 %s1204_s22, 4  ;;  %s1438_s12 = int_to_ptr.hbm [resolvable:$true] %s1437_s12 }
  0x1c   : > { %604 = vmatpush.bf16.msra.mxu0 %v1362_v2  ;;  %1374 = vmatpush.bf16.msra.mxu2 %v1362_v2  ;;  %v544_v9 = vpack.c.bf16 %v529_v8, %v528_v6  ;;  %v523_v12 = vpack.c.bf16 %v511_v11, %v510_v10  ;;  %v506_v13 = vld [vmem:[%s1624_s24 + $0x10] sm:$0xff]  ;;  %v507_v14 = vld [vmem:[%s1624_s24 + $0x18] sm:$0xff]  ;;  %v512_v19 = vld [vmem:[%s1624_s24 + $0x40] sm:$0xff]  ;;  %p1444_p0 = scmp.lt.s32.totalorder %s1438_s12, %s1847_s13 }
  0x1d   : > { %713 = vmatpush.bf16.msra.mxu1 %v1364_v3  ;;  %1375 = vmatpush.bf16.msra.mxu3 %v1362_v2  ;;  %v530_v15 = vld [vmem:[%s1629_s16 + $0x10] sm:$0xff]  ;;  %v531_v16 = vld [vmem:[%s1629_s16 + $0x18] sm:$0xff]  ;;  %v521_v17 = vpack.c.bf16 %v507_v14, %v506_v13  ;;  %v513_v20 = vld [vmem:[%s1624_s24 + $0x48] sm:$0xff] }
  0x1e   : > { %v545_v18 = vpack.c.bf16 %v531_v16, %v530_v15  ;;  %v524_v21 = vpack.c.bf16 %v513_v20, %v512_v19  ;;  %v508_v22 = vld [vmem:[%s1624_s24 + $0x20] sm:$0xff]  ;;  %v509_v23 = vld [vmem:[%s1624_s24 + $0x28] sm:$0xff]  ;;  %v514_v28 = vld [vmem:[%s1624_s24 + $0x50] sm:$0xff] }
  0x1f   : > { %1286 = vmatmul.msk.bf16.vlgmr.msra.gmra.mxu0 %vm572_vm0, %v520_v7  ;;  %1289 = vmatmul.msk.bf16.vlgmr.msra.gmra.mxu2 %vm572_vm0, %v523_v12  ;;  %v532_v24 = vld [vmem:[%s1629_s16 + $0x20] sm:$0xff]  ;;  %v533_v25 = vld [vmem:[%s1629_s16 + $0x28] sm:$0xff]  ;;  %v522_v26 = vpack.c.bf16 %v509_v23, %v508_v22  ;;  %v515_v29 = vld [vmem:[%s1624_s24 + $0x58] sm:$0xff] }
  0x20   : > { %1302 = vmatmul.msk.bf16.vlgmr.msra.gmra.mxu1 %vm572_vm0, %v544_v9  ;;  %v546_v27 = vpack.c.bf16 %v533_v25, %v532_v24  ;;  %v525_v30 = vpack.c.bf16 %v515_v29, %v514_v28  ;;  %v534_v31 = vld [vmem:[%s1629_s16 + $0x30] sm:$0xff]  ;;  %v535_v32 = vld [vmem:[%s1629_s16 + $0x38] sm:$0xff]  ;;  %v516_v34 = vld [vmem:[%s1624_s24 + $0x60] sm:$0xff]  ;;  %837 = vmatpush.bf16.msrb.mxu2 %v1369_v49 }
  0x21   : > { %v547_v33 = vpack.c.bf16 %v535_v32, %v534_v31  ;;  %v517_v35 = vld [vmem:[%s1624_s24 + $0x68] sm:$0xff]  ;;  %v536_v37 = vld [vmem:[%s1629_s16 + $0x40] sm:$0xff]  ;;  %v518_v40 = vld [vmem:[%s1624_s24 + $0x70] sm:$0xff] }
  0x22   : > { %v526_v36 = vpack.c.bf16 %v517_v35, %v516_v34  ;;  %v537_v38 = vld [vmem:[%s1629_s16 + $0x48] sm:$0xff]  ;;  %v519_v41 = vld [vmem:[%s1624_s24 + $0x78] sm:$0xff]  ;;  %v538_v43 = vld [vmem:[%s1629_s16 + $0x50] sm:$0xff]  ;;  %s473_s24 = sand.u32 1, %s1477_s28  }
  0x23   : > { %v548_v39 = vpack.c.bf16 %v537_v38, %v536_v37  ;;  %v527_v42 = vpack.c.bf16 %v519_v41, %v518_v40  ;;  %v539_v44 = vld [vmem:[%s1629_s16 + $0x58] sm:$0xff]  ;;  %v540_v46 = vld [vmem:[%s1629_s16 + $0x60] sm:$0xff]  ;;  %v541_v47 = vld [vmem:[%s1629_s16 + $0x68] sm:$0xff]  ;;  %s474_s17 = scalar_lea.vmem [#allocation3], %s473_s24 }
  0x24   : > { %1292 = vmatmul.msk.bf16.vlgmr.msra.gmra.mxu3 %vm572_vm0, %v526_v36  ;;  %v549_v45 = vpack.c.bf16 %v539_v44, %v538_v43  ;;  %v550_v48 = vpack.c.bf16 %v541_v47, %v540_v46  ;;  %v1367_v50 = vld [vmem:[%s1840_s6 + $0x8] sm:$0xff]  ;;  %v1366_v52 = vld [vmem:[%s1840_s6] sm:$0xff]  ;;  %v542_v53 = vld [vmem:[%s1629_s16 + $0x70] sm:$0xff]  ;;  %838 = vmatpush.bf16.msrb.mxu2 %v1368_v51  ;;  %s1201_s21 = sshll.u32 %s474_s17, 4  ;;  %s1202_s21 = int_to_ptr.vmem [resolvable:$true] %s1201_s21 }
  0x25   : > { %922 = vmatpush.bf16.msrb.mxu3 %v1367_v50  ;;  %v543_v54 = vld [vmem:[%s1629_s16 + $0x78] sm:$0xff]  ;;  %v1694_v58 = vld [vmem:[%s1837_s3] ss:$0 sm:$0xff]  ;;  %s1191_s16 = scalar_lea.sflag [#allocation4], %s473_s24 }
  0x26   : > { %v551_v55 = vpack.c.bf16 %v543_v54, %v542_v53  ;;  %v1699_v59 = vld [vmem:[%s1839_s5] ss:$0 sm:$0xff] }
  0x29   : > { %923 = vmatpush.bf16.msrb.mxu3 %v1366_v52 }
  0x2f   : > { %1287 = vmatmul.msk.bf16.gmra.mxu0 %vm572_vm0, %v521_v17  ;;  %1290 = vmatmul.msk.bf16.gmra.mxu2 %vm572_vm0, %v524_v21 }
  0x30   : > { %1303 = vmatmul.msk.bf16.gmra.mxu1 %vm572_vm0, %v545_v18 }
  0x34   : > { %1293 = vmatmul.msk.bf16.gmra.mxu3 %vm572_vm0, %v527_v42 }
  0x3f   : > { %1288 = vmatmul.msk.bf16.gmra.mxu0 %vm572_vm0, %v522_v26  ;;  %1291 = vmatmul.msk.bf16.gmra.mxu2 %vm572_vm0, %v525_v30 }
  0x40   : > { %1304 = vmatmul.msk.bf16.gmra.mxu1 %vm572_vm0, %v546_v27 }
  0x50   : > { %1305 = vmatmul.msk.bf16.gmra.mxu1 %vm572_vm0, %v547_v33 }
  0x60   : > { %1306 = vmatmul.msk.bf16.gmra.mxu1 %vm572_vm0, %v548_v39 }
  0x70   : > { %1307 = vmatmul.msk.bf16.gmra.mxu1 %vm572_vm0, %v549_v45 }
  0x80   : > { %1308 = vmatmul.msk.bf16.gmra.mxu1 %vm572_vm0, %v550_v48 }
  0x90   : > { %1309 = vmatmul.msk.bf16.gmra.mxu1 %vm572_vm0, %v551_v55 }
  0x9c   : > { %v606_v56 = vpop.f32.mrf.mxu0 }
  0x9d   : > { %v715_v57 = vpop.f32.mrf.mxu1  ;;  %v607_v60 = vadd.f32 %v1694_v58, %v606_v56 }
  0x9e   : > { %v716_v61 = vadd.f32 %v1699_v59, %v715_v57 }
  0x9f   : > { %v646_v2 = vmax.f32 %v607_v60, 0.0 }
  0xa0   : > { %v755_v4 = vmax.f32 %v716_v61, 0.0 }
  0xa2   : > { %v621_v23 = vpop.f32.mrf.mxu2 }
  0xa3   : > { %v622_v40 = vadd.f32 %v1694_v58, %v621_v23 }
  0xa4   : > { %v608_v62 = vpop.f32.mrf.mxu0 }
  0xa5   : > { %v609_v63 = vadd.f32 %v1694_v58, %v608_v62  ;;  %v717_v0 = vpop.f32.mrf.mxu1  ;;  %v652_v43 = vmax.f32 %v622_v40, 0.0  ;;  %v1371_v40 = vld [vmem:[%s1843_s9 + $0x8] sm:$0xff] }
  0xa6   : > { %v718_v1 = vadd.f32 %v1699_v59, %v717_v0  ;;  %1059 = vmatpush.bf16.msrb.mxu0 %v1371_v40 }
  0xa7   : > { %v647_v3 = vmax.f32 %v609_v63, 0.0 }
  0xa8   : > { %v756_v5 = vmax.f32 %v718_v1, 0.0 }
  0xa9   : > { %v771_v6 = vpack.c.bf16 %v647_v3, %v646_v2 }
  0xaa   : > { %v783_v7 = vpack.c.bf16 %v756_v5, %v755_v4  ;;  %v623_v31 = vpop.f32.mrf.mxu2  ;;  %v636_v5 = vpop.f32.mrf.mxu3 }
  0xab   : > { %1334 = vmatmul.msk.bf16.vlgmr.msrb.gmra.mxu3 %vm572_vm0, %v771_v6  ;;  %v624_v41 = vadd.f32 %v1694_v58, %v623_v31 }
  0xac   : > { %1318 = vmatmul.msk.bf16.vlgmr.msrb.gmra.mxu2 %vm572_vm0, %v783_v7  ;;  %v611_v8 = vpop.f32.mrf.mxu0 }
  0xad   : > { %v720_v9 = vpop.f32.mrf.mxu1  ;;  %v612_v10 = vadd.f32 %v1694_v58, %v611_v8  ;;  %v653_v44 = vmax.f32 %v624_v41, 0.0 }
  0xae   : > { %v721_v11 = vadd.f32 %v1699_v59, %v720_v9 }
  0xaf   : > { %v648_v16 = vmax.f32 %v612_v10, 0.0  ;;  %v774_v49 = vpack.c.bf16 %v653_v44, %v652_v43 }
  0xb0   : > { %v757_v18 = vmax.f32 %v721_v11, 0.0 }
  0xb2   : > { %v626_v39 = vpop.f32.mrf.mxu2 }
  0xb3   : > { %v627_v53 = vadd.f32 %v1694_v58, %v626_v39 }
  0xb4   : > { %v613_v12 = vpop.f32.mrf.mxu0 }
  0xb5   : > { %v614_v13 = vadd.f32 %v1694_v58, %v613_v12  ;;  %v722_v14 = vpop.f32.mrf.mxu1  ;;  %v654_v57 = vmax.f32 %v627_v53, 0.0 }
  0xb6   : > { %v723_v15 = vadd.f32 %v1699_v59, %v722_v14 }
  0xb7   : > { %v649_v17 = vmax.f32 %v614_v13, 0.0 }
  0xb8   : > { %v758_v19 = vmax.f32 %v723_v15, 0.0 }
  0xb9   : > { %v772_v20 = vpack.c.bf16 %v649_v17, %v648_v16  ;;  %v638_v17 = vpop.f32.mrf.mxu3 }
  0xba   : > { %v784_v21 = vpack.c.bf16 %v758_v19, %v757_v18  ;;  %v628_v51 = vpop.f32.mrf.mxu2  ;;  %v637_v19 = vadd.f32 %v1694_v58, %v636_v5 }
  0xbb   : > { %1335 = vmatmul.msk.bf16.gmra.mxu3 %vm572_vm0, %v772_v20  ;;  %v629_v54 = vadd.f32 %v1694_v58, %v628_v51  ;;  %v639_v20 = vadd.f32 %v1694_v58, %v638_v17 }
  0xbc   : > { %1319 = vmatmul.msk.bf16.gmra.mxu2 %vm572_vm0, %v784_v21  ;;  %v616_v22 = vpop.f32.mrf.mxu0  ;;  %v658_v23 = vmax.f32 %v637_v19, 0.0 }
  0xbd   : > { %v725_v24 = vpop.f32.mrf.mxu1  ;;  %v617_v25 = vadd.f32 %v1694_v58, %v616_v22  ;;  %v655_v60 = vmax.f32 %v629_v54, 0.0 }
  0xbe   : > { %v726_v26 = vadd.f32 %v1699_v59, %v725_v24  ;;  %v659_v24 = vmax.f32 %v639_v20, 0.0 }
  0xbf   : > { %v650_v32 = vmax.f32 %v617_v25, 0.0  ;;  %v775_v1 = vpack.c.bf16 %v655_v60, %v654_v57 }
  0xc0   : > { %v759_v34 = vmax.f32 %v726_v26, 0.0 }
  0xc1   : > { %v641_v22 = vpop.f32.mrf.mxu3 }
  0xc2   : > { %v631_v56 = vpop.f32.mrf.mxu2 }
  0xc3   : > { %v632_v6 = vadd.f32 %v1694_v58, %v631_v56 }
  0xc4   : > { %v618_v27 = vpop.f32.mrf.mxu0 }
  0xc5   : > { %v619_v28 = vadd.f32 %v1694_v58, %v618_v27  ;;  %v727_v29 = vpop.f32.mrf.mxu1  ;;  %v656_v9 = vmax.f32 %v632_v6, 0.0 }
  0xc6   : > { %v728_v30 = vadd.f32 %v1699_v59, %v727_v29  ;;  %v777_v29 = vpack.c.bf16 %v659_v24, %v658_v23 }
  0xc7   : > { %v651_v33 = vmax.f32 %v619_v28, 0.0 }
  0xc8   : > { %v760_v35 = vmax.f32 %v728_v30, 0.0 }
  0xc9   : > { %v773_v36 = vpack.c.bf16 %v651_v33, %v650_v32  ;;  %v643_v32 = vpop.f32.mrf.mxu3  ;;  %v642_v33 = vadd.f32 %v1694_v58, %v641_v22 }
  0xca   : > { %v785_v37 = vpack.c.bf16 %v760_v35, %v759_v34  ;;  %v633_v4 = vpop.f32.mrf.mxu2  ;;  %v644_v34 = vadd.f32 %v1694_v58, %v643_v32 }
  0xcb   : > { %1336 = vmatmul.msk.bf16.gmra.mxu3 %vm572_vm0, %v773_v36  ;;  %v634_v7 = vadd.f32 %v1694_v58, %v633_v4  ;;  %v660_v36 = vmax.f32 %v642_v33, 0.0  ;;  %v1370_v58 = vld [vmem:[%s1843_s9] sm:$0xff] }
  0xcc   : > { %1320 = vmatmul.msk.bf16.gmra.mxu2 %vm572_vm0, %v785_v37  ;;  %v661_v37 = vmax.f32 %v644_v34, 0.0  ;;  %1060 = vmatpush.bf16.msrb.mxu0 %v1370_v58 }
  0xcd   : > { %v730_v38 = vpop.f32.mrf.mxu1  ;;  %v657_v10 = vmax.f32 %v634_v7, 0.0 }
  0xce   : > { %v731_v42 = vadd.f32 %v1699_v59, %v730_v38  ;;  %v778_v43 = vpack.c.bf16 %v661_v37, %v660_v36 }
  0xcf   : > { %v776_v15 = vpack.c.bf16 %v657_v10, %v656_v9 }
  0xd0   : > { %v761_v47 = vmax.f32 %v731_v42, 0.0 }
  0xd5   : > { %v732_v45 = vpop.f32.mrf.mxu1 }
  0xd6   : > { %v733_v46 = vadd.f32 %v1699_v59, %v732_v45 }
  0xd8   : > { %v762_v48 = vmax.f32 %v733_v46, 0.0 }
  0xda   : > { %v786_v50 = vpack.c.bf16 %v762_v48, %v761_v47  ;;  %v1758_v47 = vld [vmem:[%s1842_s8] ss:$0 sm:$0xff] }
  0xdb   : > { %1337 = vmatmul.msk.bf16.gmra.mxu3 %vm572_vm0, %v774_v49 }
  0xdc   : > { %1321 = vmatmul.msk.bf16.gmra.mxu2 %vm572_vm0, %v786_v50 }
  0xdd   : > { %v735_v52 = vpop.f32.mrf.mxu1 }
  0xde   : > { %v736_v55 = vadd.f32 %v1699_v59, %v735_v52 }
  0xe0   : > { %v763_v63 = vmax.f32 %v736_v55, 0.0 }
  0xe5   : > { %v737_v61 = vpop.f32.mrf.mxu1 }
  0xe6   : > { %v738_v62 = vadd.f32 %v1699_v59, %v737_v61 }
  0xe8   : > { %v764_v0 = vmax.f32 %v738_v62, 0.0 }
  0xea   : > { %v787_v2 = vpack.c.bf16 %v764_v0, %v763_v63 }
  0xeb   : > { %1338 = vmatmul.msk.bf16.gmra.mxu3 %vm572_vm0, %v775_v1 }
  0xec   : > { %1322 = vmatmul.msk.bf16.gmra.mxu2 %vm572_vm0, %v787_v2 }
  0xed   : > { %v740_v3 = vpop.f32.mrf.mxu1 }
  0xee   : > { %v741_v8 = vadd.f32 %v1699_v59, %v740_v3 }
  0xf0   : > { %v765_v13 = vmax.f32 %v741_v8, 0.0 }
  0xf5   : > { %v742_v11 = vpop.f32.mrf.mxu1 }
  0xf6   : > { %v743_v12 = vadd.f32 %v1699_v59, %v742_v11 }
  0xf8   : > { %v766_v14 = vmax.f32 %v743_v12, 0.0 }
  0xfa   : > { %v788_v16 = vpack.c.bf16 %v766_v14, %v765_v13 }
  0xfb   : > { %1339 = vmatmul.msk.bf16.gmra.mxu3 %vm572_vm0, %v776_v15 }
  0xfc   : > { %1323 = vmatmul.msk.bf16.gmra.mxu2 %vm572_vm0, %v788_v16 }
  0xfd   : > { %v745_v18 = vpop.f32.mrf.mxu1 }
  0xfe   : > { %v746_v21 = vadd.f32 %v1699_v59, %v745_v18 }
 0x100   : > { %v767_v27 = vmax.f32 %v746_v21, 0.0 }
 0x105   : > { %v747_v25 = vpop.f32.mrf.mxu1 }
 0x106   : > { %v748_v26 = vadd.f32 %v1699_v59, %v747_v25 }
 0x108   : > { %v768_v28 = vmax.f32 %v748_v26, 0.0 }
 0x10a   : > { %v789_v30 = vpack.c.bf16 %v768_v28, %v767_v27 }
 0x10b   : > { %1340 = vmatmul.msk.bf16.gmra.mxu3 %vm572_vm0, %v777_v29 }
 0x10c   : > { %1324 = vmatmul.msk.bf16.gmra.mxu2 %vm572_vm0, %v789_v30 }
 0x10d   : > { %v750_v31 = vpop.f32.mrf.mxu1 }
 0x10e   : > { %v751_v35 = vadd.f32 %v1699_v59, %v750_v31 }
 0x110   : > { %v769_v41 = vmax.f32 %v751_v35, 0.0 }
 0x115   : > { %v752_v38 = vpop.f32.mrf.mxu1 }
 0x116   : > { %v753_v39 = vadd.f32 %v1699_v59, %v752_v38 }
 0x118   : > { %v770_v42 = vmax.f32 %v753_v39, 0.0 }
 0x11a   : > { %v790_v44 = vpack.c.bf16 %v770_v42, %v769_v41 }
 0x11b   : > { %1341 = vmatmul.msk.bf16.gmra.mxu3 %vm572_vm0, %v778_v43 }
 0x11c   : > { %1325 = vmatmul.msk.bf16.gmra.mxu2 %vm572_vm0, %v790_v44 }
 0x12e   : > { %v925_v45 = vpop.f32.mrf.mxu3 }
 0x12f   : > { %v840_v59 = vpop.f32.mrf.mxu2 }
 0x130   : > { %v926_v46 = vadd.f32 %v925_v45, %v840_v59 }
 0x132   : > { %v969_v50 = vadd.f32 %v1758_v47, %v926_v46 }
 0x134   : > { %v985_v53 = vmax.f32 %v969_v50, 0.0 }
 0x136   : > { %v927_v48 = vpop.f32.mrf.mxu3 }
 0x137   : > { %v842_v49 = vpop.f32.mrf.mxu2 }
 0x138   : > { %v928_v51 = vadd.f32 %v927_v48, %v842_v49 }
 0x13a   : > { %v970_v52 = vadd.f32 %v1758_v47, %v928_v51 }
 0x13c   : > { %v986_v54 = vmax.f32 %v970_v52, 0.0 }
 0x13e   : > { %v1001_v55 = vpack.c.bf16 %v986_v54, %v985_v53  ;;  %v930_v56 = vpop.f32.mrf.mxu3 }
 0x13f   : > { %v845_v57 = vpop.f32.mrf.mxu2 }
 0x140   : > { %1350 = vmatmul.msk.bf16.vlgmr.msrb.gmra.mxu0 %vm572_vm0, %v1001_v55  ;;  %v931_v60 = vadd.f32 %v930_v56, %v845_v57 }
 0x142   : > { %v971_v63 = vadd.f32 %v1758_v47, %v931_v60 }
 0x144   : > { %v987_v2 = vmax.f32 %v971_v63, 0.0 }
 0x146   : > { %v932_v61 = vpop.f32.mrf.mxu3 }
 0x147   : > { %v847_v62 = vpop.f32.mrf.mxu2 }
 0x148   : > { %v933_v0 = vadd.f32 %v932_v61, %v847_v62 }
 0x14a   : > { %v972_v1 = vadd.f32 %v1758_v47, %v933_v0 }
 0x14c   : > { %v988_v3 = vmax.f32 %v972_v1, 0.0 }
 0x14e   : > { %v935_v4 = vpop.f32.mrf.mxu3  ;;  %v1002_v5 = vpack.c.bf16 %v988_v3, %v987_v2 }
 0x14f   : > { %v850_v6 = vpop.f32.mrf.mxu2 }
 0x150   : > { %1351 = vmatmul.msk.bf16.gmra.mxu0 %vm572_vm0, %v1002_v5  ;;  %v936_v7 = vadd.f32 %v935_v4, %v850_v6 }
 0x152   : > { %v973_v10 = vadd.f32 %v1758_v47, %v936_v7 }
 0x154   : > { %v989_v13 = vmax.f32 %v973_v10, 0.0 }
 0x156   : > { %v937_v8 = vpop.f32.mrf.mxu3 }
 0x157   : > { %v852_v9 = vpop.f32.mrf.mxu2 }
 0x158   : > { %v938_v11 = vadd.f32 %v937_v8, %v852_v9  ;;  %v1418_v9 = vld [vmem:[%s1844_s10] ss:$0 sm:$0xff] }
 0x15a   : > { %v974_v12 = vadd.f32 %v1758_v47, %v938_v11 }
 0x15c   : > { %v990_v14 = vmax.f32 %v974_v12, 0.0 }
 0x15e   : > { %v940_v15 = vpop.f32.mrf.mxu3  ;;  %v1003_v16 = vpack.c.bf16 %v990_v14, %v989_v13 }
 0x15f   : > { %v855_v17 = vpop.f32.mrf.mxu2 }
 0x160   : > { %1352 = vmatmul.msk.bf16.gmra.mxu0 %vm572_vm0, %v1003_v16  ;;  %v941_v18 = vadd.f32 %v940_v15, %v855_v17 }
 0x162   : > { %v975_v21 = vadd.f32 %v1758_v47, %v941_v18 }
 0x164   : > { %v991_v24 = vmax.f32 %v975_v21, 0.0 }
 0x166   : > { %v942_v19 = vpop.f32.mrf.mxu3 }
 0x167   : > { %v857_v20 = vpop.f32.mrf.mxu2 }
 0x168   : > { %v943_v22 = vadd.f32 %v942_v19, %v857_v20 }
 0x16a   : > { %v976_v23 = vadd.f32 %v1758_v47, %v943_v22 }
 0x16c   : > { %v992_v25 = vmax.f32 %v976_v23, 0.0 }
 0x16e   : > { %v945_v26 = vpop.f32.mrf.mxu3  ;;  %v1004_v27 = vpack.c.bf16 %v992_v25, %v991_v24 }
 0x16f   : > { %v860_v28 = vpop.f32.mrf.mxu2 }
 0x170   : > { %1353 = vmatmul.msk.bf16.gmra.mxu0 %vm572_vm0, %v1004_v27  ;;  %v946_v29 = vadd.f32 %v945_v26, %v860_v28 }
 0x172   : > { %v977_v32 = vadd.f32 %v1758_v47, %v946_v29 }
 0x174   : > { %v993_v35 = vmax.f32 %v977_v32, 0.0 }
 0x176   : > { %v947_v30 = vpop.f32.mrf.mxu3 }
 0x177   : > { %v862_v31 = vpop.f32.mrf.mxu2 }
 0x178   : > { %v948_v33 = vadd.f32 %v947_v30, %v862_v31 }
 0x17a   : > { %v978_v34 = vadd.f32 %v1758_v47, %v948_v33 }
 0x17c   : > { %v994_v36 = vmax.f32 %v978_v34, 0.0 }
 0x17e   : > { %v950_v37 = vpop.f32.mrf.mxu3  ;;  %v1005_v38 = vpack.c.bf16 %v994_v36, %v993_v35 }
 0x17f   : > { %v865_v39 = vpop.f32.mrf.mxu2 }
 0x180   : > { %1354 = vmatmul.msk.bf16.gmra.mxu0 %vm572_vm0, %v1005_v38  ;;  %v951_v40 = vadd.f32 %v950_v37, %v865_v39 }
 0x182   : > { %v979_v43 = vadd.f32 %v1758_v47, %v951_v40 }
 0x184   : > { %v995_v45 = vmax.f32 %v979_v43, 0.0 }
 0x186   : > { %v952_v41 = vpop.f32.mrf.mxu3 }
 0x187   : > { %v867_v42 = vpop.f32.mrf.mxu2 }
 0x188   : > { %v953_v44 = vadd.f32 %v952_v41, %v867_v42 }
 0x18a   : > { %v980_v58 = vadd.f32 %v1758_v47, %v953_v44 }
 0x18c   : > { %v996_v59 = vmax.f32 %v980_v58, 0.0 }
 0x18e   : > { %v955_v46 = vpop.f32.mrf.mxu3  ;;  %v1006_v48 = vpack.c.bf16 %v996_v59, %v995_v45 }
 0x18f   : > { %v870_v49 = vpop.f32.mrf.mxu2 }
 0x190   : > { %1355 = vmatmul.msk.bf16.gmra.mxu0 %vm572_vm0, %v1006_v48  ;;  %v956_v50 = vadd.f32 %v955_v46, %v870_v49 }
 0x192   : > { %v981_v53 = vadd.f32 %v1758_v47, %v956_v50 }
 0x194   : > { %v997_v56 = vmax.f32 %v981_v53, 0.0 }
 0x196   : > { %v957_v51 = vpop.f32.mrf.mxu3 }
 0x197   : > { %v872_v52 = vpop.f32.mrf.mxu2 }
 0x198   : > { %v958_v54 = vadd.f32 %v957_v51, %v872_v52 }
 0x19a   : > { %v982_v55 = vadd.f32 %v1758_v47, %v958_v54 }
 0x19c   : > { %v998_v57 = vmax.f32 %v982_v55, 0.0 }
 0x19e   : > { %v960_v60 = vpop.f32.mrf.mxu3  ;;  %v1007_v61 = vpack.c.bf16 %v998_v57, %v997_v56 }
 0x19f   : > { %v875_v62 = vpop.f32.mrf.mxu2 }
 0x1a0   : > { %1356 = vmatmul.msk.bf16.gmra.mxu0 %vm572_vm0, %v1007_v61  ;;  %v961_v63 = vadd.f32 %v960_v60, %v875_v62 }
 0x1a2   : > { %v983_v2 = vadd.f32 %v1758_v47, %v961_v63 }
 0x1a4   : > { %v999_v5 = vmax.f32 %v983_v2, 0.0 }
 0x1a6   : > { %v962_v0 = vpop.f32.mrf.mxu3 }
 0x1a7   : > { %v877_v1 = vpop.f32.mrf.mxu2 }
 0x1a8   : > { %v963_v3 = vadd.f32 %v962_v0, %v877_v1 }
 0x1aa   : > { %v984_v4 = vadd.f32 %v1758_v47, %v963_v3 }
 0x1ac   : > { %v1000_v6 = vmax.f32 %v984_v4, 0.0 }
 0x1ae   : > { %v1008_v7 = vpack.c.bf16 %v1000_v6, %v999_v5 }
 0x1b0   : > { %1357 = vmatmul.msk.bf16.gmra.mxu0 %vm572_vm0, %v1008_v7 }
 0x1bd   : > { %v1062_v8 = vpop.f32.mrf.mxu0 }
 0x1be   : > { %v1063_v10 = vadd.f32 %v1418_v9, %v1062_v8 }
 0x1c0   : > { %v1102_v13 = vmax.f32 %v1063_v10, 0.0  ;;  %v1128_v10 = vstv %s1127_s23  ;;  %s1439_s23 = scalar_lea.hbm %s1438_s12, 1 }
 0x1c1   : > { %p1440_p11 = scmp.ne.s32.totalorder %s1438_s12, %s1439_s23  ;;  %p1445_p1 = scmp.lt.s32.totalorder %s1443_s25, %s1439_s23 }
 0x1c3   : > { %p1441_p12 = pnand %p1440_p11, %p1598_p5  ;;  %p1446_p2 = por %p1445_p1, %p1444_p0 }
 0x1c5   : > { %v1064_v11 = vpop.f32.mrf.mxu0  ;;  %p1442_p13 = pneg %p1441_p12 }
 0x1c6   : > { %v1065_v12 = vadd.f32 %v1418_v9, %v1064_v11 }
 0x1c7   : > { %p1447_p3 = pnand %p1446_p2, %p1442_p13 }
 0x1c8   : > { %v1103_v14 = vmax.f32 %v1065_v12, 0.0 }
 0x1ca   : > { %v1787_v15 = vpack.c.bf16 %v1103_v14, %v1102_v13 }
 0x1cc   : > { %v1134_v8 = vsel %vm1129_vm1, %v1787_v15, 0 }
 0x1cd   : > { %v1067_v16 = vpop.f32.mrf.mxu0 }
 0x1ce   : > { %v1068_v17 = vadd.f32 %v1418_v9, %v1067_v16 }
 0x1d0   : > { %v1104_v19 = vmax.f32 %v1068_v17, 0.0 }
 0x1d5   : > { %v1069_v47 = vpop.f32.mrf.mxu0 }
 0x1d6   : > { %v1070_v18 = vadd.f32 %v1418_v9, %v1069_v47 }
 0x1d8   : > { %v1105_v20 = vmax.f32 %v1070_v18, 0.0 }
 0x1da   : > { %v1120_v21 = vpack.c.bf16 %v1105_v20, %v1104_v19 }
 0x1dc   : > { %v1137_v7 = vsel %vm1129_vm1, %v1120_v21, 0 }
 0x1dd   : > { %v1072_v22 = vpop.f32.mrf.mxu0 }
 0x1de   : > { %v1073_v23 = vadd.f32 %v1418_v9, %v1072_v22 }
 0x1e0   : > { %v1106_v26 = vmax.f32 %v1073_v23, 0.0 }
 0x1e5   : > { %v1074_v24 = vpop.f32.mrf.mxu0 }
 0x1e6   : > { %v1075_v25 = vadd.f32 %v1418_v9, %v1074_v24 }
 0x1e8   : > { %v1107_v27 = vmax.f32 %v1075_v25, 0.0 }
 0x1ea   : > { %v1121_v28 = vpack.c.bf16 %v1107_v27, %v1106_v26 }
 0x1ec   : > { %v1140_v6 = vsel %vm1129_vm1, %v1121_v28, 0 }
 0x1ed   : > { %v1077_v29 = vpop.f32.mrf.mxu0 }
 0x1ee   : > { %v1078_v30 = vadd.f32 %v1418_v9, %v1077_v29 }
 0x1f0   : > { %v1108_v33 = vmax.f32 %v1078_v30, 0.0 }
 0x1f5   : > { %v1079_v31 = vpop.f32.mrf.mxu0 }
 0x1f6   : > { %v1080_v32 = vadd.f32 %v1418_v9, %v1079_v31 }
 0x1f8   : > { %v1109_v34 = vmax.f32 %v1080_v32, 0.0 }
 0x1fa   : > { %v1122_v35 = vpack.c.bf16 %v1109_v34, %v1108_v33 }
 0x1fc   : > { %v1143_v5 = vsel %vm1129_vm1, %v1122_v35, 0 }
 0x1fd   : > { %v1082_v36 = vpop.f32.mrf.mxu0 }
 0x1fe   : > { %v1083_v37 = vadd.f32 %v1418_v9, %v1082_v36 }
 0x200   : > { %v1110_v40 = vmax.f32 %v1083_v37, 0.0 }
 0x205   : > { %v1084_v38 = vpop.f32.mrf.mxu0 }
 0x206   : > { %v1085_v39 = vadd.f32 %v1418_v9, %v1084_v38 }
 0x208   : > { %v1111_v41 = vmax.f32 %v1085_v39, 0.0 }
 0x20a   : > { %v1123_v42 = vpack.c.bf16 %v1111_v41, %v1110_v40 }
 0x20c   : > { %v1146_v4 = vsel %vm1129_vm1, %v1123_v42, 0 }
 0x20d   : > { %v1087_v43 = vpop.f32.mrf.mxu0 }
 0x20e   : > { %v1088_v62 = vadd.f32 %v1418_v9, %v1087_v43 }
 0x210   : > { %v1112_v1 = vmax.f32 %v1088_v62, 0.0 }
 0x215   : > { %v1089_v44 = vpop.f32.mrf.mxu0 }
 0x216   : > { %v1090_v60 = vadd.f32 %v1418_v9, %v1089_v44 }
 0x218   : > { %v1113_v63 = vmax.f32 %v1090_v60, 0.0 }
 0x21a   : > { %v1124_v2 = vpack.c.bf16 %v1113_v63, %v1112_v1 }
 0x21c   : > { %v1149_v3 = vsel %vm1129_vm1, %v1124_v2, 0 }
 0x21d   : > { %v1092_v58 = vpop.f32.mrf.mxu0 }
 0x21e   : > { %v1093_v53 = vadd.f32 %v1418_v9, %v1092_v58 }
 0x220   : > { %v1114_v57 = vmax.f32 %v1093_v53, 0.0 }
 0x225   : > { %v1094_v45 = vpop.f32.mrf.mxu0 }
 0x226   : > { %v1095_v50 = vadd.f32 %v1418_v9, %v1094_v45 }
 0x228   : > { %v1115_v55 = vmax.f32 %v1095_v50, 0.0 }
 0x22a   : > { %v1125_v61 = vpack.c.bf16 %v1115_v55, %v1114_v57 }
 0x22c   : > { %v1152_v0 = vsel %vm1129_vm1, %v1125_v61, 0 }
 0x22d   : > { %v1097_v59 = vpop.f32.mrf.mxu0 }
 0x22e   : > { %v1098_v46 = vadd.f32 %v1418_v9, %v1097_v59 }
 0x230   : > { %v1116_v51 = vmax.f32 %v1098_v46, 0.0 }
 0x235   : > { %v1099_v48 = vpop.f32.mrf.mxu0 }
 0x236   : > { %v1100_v49 = vadd.f32 %v1418_v9, %v1099_v48  ;;  %v1118_v9 = vld [vmem:[%s1845_s11] sm:$0x1] }
 0x238   : > { %v1117_v52 = vmax.f32 %v1100_v49, 0.0 }
 0x23a   : > { %v1126_v54 = vpack.c.bf16 %v1117_v52, %v1116_v51 }
 0x23c   : > { %v1155_v56 = vsel %vm1129_vm1, %v1126_v54, 0 }
 0x23d   : > { %1157 = vmatpush.bf16.xpose.msrb.mxu1 %v1155_v56 }
 0x245   : > { %1158 = vmatpush.bf16.xpose.msrb.mxu1 %v1152_v0 }
 0x24d   : > { %1159 = vmatpush.bf16.xpose.msrb.mxu1 %v1149_v3 }
 0x255   : > { %1160 = vmatpush.bf16.xpose.msrb.mxu1 %v1146_v4 }
 0x25d   : > { %1161 = vmatpush.bf16.xpose.msrb.mxu1 %v1143_v5 }
 0x265   : > { %1162 = vmatpush.bf16.xpose.msrb.mxu1 %v1140_v6 }
 0x26d   : > { %1163 = vmatpush.bf16.xpose.msrb.mxu1 %v1137_v7 }
 0x275   : > { %1164 = vmatpush.bf16.xpose.msrb.mxu1 %v1134_v8 }
 0x27c   : > { %1358 = vmatmul.msk.bf16.vlgmr.msrb.gmra.mxu1 %vm1129_vm1, %v1118_v9 }
 0x2f9   : > { %v1166_v11 = vpop.f32.mrf.mxu1 }
 0x2fa   : > { %v1167_v12 = vadd.f32 %v1166_v11, %v1128_v10 }
 0x2fc   : > { %v1359_v13 = vmul.f32 -1.442695, %v1167_v12 }
 0x2fe   : > { %1419 = vpow2.f32 %v1359_v13 }
 0x301   : > { %v1168_v14 = vpop.f32.mrf.mxu1 }
 0x304   : > { %v1420_v16 = vpop.eup %1419 }
 0x305   : > { %v1173_v17 = vadd.f32 1.0, %v1420_v16 }
 0x307   : > { %1421 = vrcp.f32 %v1173_v17  ;;  %v1185_v19 = vand.u32 2147483648, %v1173_v17  ;;  %v1183_v21 = vand.u32 2147483647, %v1173_v17  ;;  %vm1179_vm3 = vweird.f32 %v1173_v17 }
 0x309   : > { %v1186_v23 = vor.u32 1.1754944e-38, %v1185_v19  ;;  %vm1184_vm5 = vcmp.eq.f32.partialorder %v1183_v21, 8.507059e+37 }
 0x30d   : > { %v1422_v47 = vpop.eup %1421 }
 0x30e   : > { %v1175_v15 = vmul.f32 %v1422_v47, %v1173_v17  ;;  %vm1180_vm2 = vweird.f32 %v1422_v47 }
 0x30f   : > { %vm1181_vm4 = vmor %vm1179_vm3, %vm1180_vm2 }
 0x310   : > { %v1176_v18 = vsub.f32 1.0, %v1175_v15 }
 0x312   : > { %v1177_v20 = vmul.f32 %v1422_v47, %v1176_v18 }
 0x314   : > { %v1178_v22 = vadd.f32 %v1422_v47, %v1177_v20 }
 0x316   : > { %v1182_v24 = vsel %vm1181_vm4, %v1422_v47, %v1178_v22 }
 0x317   : > { %v1187_v25 = vsel %vm1184_vm5, %v1186_v23, %v1182_v24 }
 0x318   : > { %1189 = vst [vmem:[%s474_s17] sm:$0x1] %v1187_v25 }
 0x319   : > { %1450 = shalt.err (!%p1447_p3)
}
 0x31a   : > { %1376 = dma.vmem_to_hbm [thread:$0]  (%p1598_p5), %s1202_s21, 16, %s1204_s22, %s1191_s16  }
 0x31b PF: > { %p1382_p4 = scmp.ge.s32.totalorder %s1485_s30, 2  ;;  %s1215_s24 = sand.u32 1, %s1473_s27  }
 0x31c   : > { %s1216_s17 = scalar_lea.sflag [#allocation4], %s1215_s24 }
 0x31d   : > { %p1379_p7 = pnand %p1382_p4, %p1602_p6 }
 0x31f   : > { %p1380_p8 = pneg %p1379_p7 }
 0x321   : > { %1468 = dma.done.wait (%p1380_p8), %s1216_s17, 16  }
 0x322   : > { %1470 = vsyncadd (%p1380_p8), %s1216_s17, 4294967280  ;;  %p24_p9 = scmp.ge.s32.totalorder %s1585_s15, 6   ;;  %s1854_s27 = smov %s1477_s28 }
 0x323   : > { %s1855_s28 = smov %s1481_s29  ;;  %s1856_s29 = smov %s1596_s18 }
 0x324   : > { %s1857_s30 = smov %s1585_s15  ;;  %26 = sbr.rel (!%p24_p9) target bundleno = 7 (0x7), region = 110 }
 0x329   :  { %1221 = vsyncpa [#allocation4], 1 }
 0x32a   :  { %1223 = vsyncpa [#allocation4 + $0x1], 1 }

</bundles_post_ra>
